<compile_context>
chip_gen: v7x
topology: tpu7x:2x2x1
jax: 0.10.0
libtpu: 0.0.40
codegen_flags: <defaults>
</compile_context>

<pallas_src>
import functools

import jax
import jax.numpy as jnp
from jax.experimental import pallas as pl
from jax.experimental.pallas import tpu as pltpu


_NEG = -1e30  # finite "minus infinity" (avoids inf/NaN in masked math)


def _attn_agg_kernel(idx_ref, msg_ref, w_ref, out_ref, stat_ref):
    nb = pl.program_id(0)       # node block
    phase = pl.program_id(1)    # 0: softmax stats, 1: aggregate
    tile = pl.program_id(2)     # message tile

    n_blk = out_ref.shape[0]
    tm = msg_ref.shape[0]
    nh = w_ref.shape[0]

    msg = msg_ref[...].astype(jnp.float32)            # [tm, D]
    w = w_ref[...].astype(jnp.float32)                # [H, D]
    idx = idx_ref[...]                                # [1, tm] int32

    base = nb * n_blk
    node_iota = jax.lax.broadcasted_iota(jnp.int32, (n_blk, tm), 0) + base
    onehot_b = node_iota == idx                       # [Nb, tm] bool (nodes x messages)
    onehot = onehot_b.astype(jnp.float32)             # [Nb, tm]
    in_block = (idx >= base) & (idx < base + n_blk)   # [1, tm] bool

    # Head-major scores, messages on lanes: scores[h, j] = <w_h, msg_j>.  Computed
    # once per (node block, tile); no duplicate [tm,H]-orientation matmul.
    scores = jax.lax.dot_general(
        w, msg, (((1,), (1,)), ((), ())),
        preferred_element_type=jnp.float32)           # [H, tm]

    @pl.when((phase == 0) & (tile == 0))
    def _init():
        # stat rows [0:H] running max -> -inf, rows [H:2H] exp-sum -> 0, row [2H] count -> 0
        row = jax.lax.broadcasted_iota(jnp.int32, stat_ref.shape, 0)
        stat_ref[...] = jnp.where(row < nh, jnp.float32(_NEG), jnp.float32(0.0))

    @pl.when(phase == 0)
    def _stats_pass():
        # Vectorized per-(head, node) tile max: one mask, one lane reduce, one store.
        masked = jnp.where(onehot_b[None, :, :], scores[:, None, :],
                           jnp.float32(_NEG))                      # [H, Nb, tm]
        tile_max = jnp.max(masked, axis=-1)                        # [H, Nb]

        old_max = stat_ref[0:nh, :]                                # [H, Nb]
        new_max = jnp.maximum(old_max, tile_max)
        stat_ref[0:nh, :] = new_max
        # Online-softmax rescale of running exp-sums (counts are not rescaled).
        stat_ref[nh:2 * nh, :] = stat_ref[nh:2 * nh, :] * jnp.exp(old_max - new_max)

        # Gather the updated per-node max back to messages (MXU one-hot gather).
        msg_max = jnp.dot(new_max, onehot,
                          preferred_element_type=jnp.float32)      # [H, tm]
        e = jnp.exp(jnp.where(in_block, scores - msg_max,
                              jnp.float32(_NEG)))                  # [H, tm]
        # Fused scatter of exp-sums and counts: one [(H+1),tm] x [tm,Nb] matmul.
        stacked = jnp.concatenate([e, jnp.ones((1, tm), jnp.float32)], axis=0)
        partial = jax.lax.dot_general(
            stacked, onehot, (((1,), (1,)), ((), ())),
            preferred_element_type=jnp.float32)                    # [H+1, Nb]
        stat_ref[nh:2 * nh + 1, :] = stat_ref[nh:2 * nh + 1, :] + partial

    @pl.when(phase == 1)
    def _aggregate_pass():
        @pl.when(tile == 0)
        def _finalize():
            # Per-node reciprocals once (O(N*H), not O(m*H)); guard empty groups.
            gsum = stat_ref[nh:2 * nh, :]
            stat_ref[nh:2 * nh, :] = jnp.where(gsum > 0.0, 1.0 / gsum, 0.0)
            cnt = stat_ref[2 * nh:2 * nh + 1, :]
            stat_ref[2 * nh:2 * nh + 1, :] = jnp.where(
                cnt > 0.0, 1.0 / (cnt * jnp.float32(nh)), 0.0)
            # Output block is resident across (phase, tile): accumulate in place.
            out_ref[...] = jnp.zeros_like(out_ref)

        # One fused gather of [gmax; 1/gsum; 1/(cnt*H)] back to messages.
        gathered = jnp.dot(stat_ref[...], onehot,
                           preferred_element_type=jnp.float32)     # [2H+1, tm]
        msg_max = gathered[0:nh, :]
        msg_inv = gathered[nh:2 * nh, :]
        msg_scale = gathered[2 * nh:2 * nh + 1, :]

        attn = jnp.exp(jnp.where(in_block, scores - msg_max,
                                 jnp.float32(_NEG))) * msg_inv     # [H, tm]
        weight = jnp.sum(attn, axis=0, keepdims=True) * msg_scale  # [1, tm]
        lhs = onehot * weight                                      # [Nb, tm]
        out_ref[...] += jnp.dot(lhs, msg,
                                preferred_element_type=jnp.float32)  # [Nb, D]


def _round_up(x, n):
    return ((x + n - 1) // n) * n


@functools.partial(jax.jit, static_argnames=("dim_size", "tile_m", "node_block"))
def simple_attention_aggregator(msg, index, t, dim_size, attn_weights, *,
                                tile_m=512, node_block=256):
    """msg: [m, D], index: [m] int, t: [m] (unused, matches torch signature),
    attn_weights: [H, D] (stacked nn.Linear(D, 1, bias=False) weights)."""
    del t  # accepted but unused by the torch forward
    m, d = msg.shape
    num_heads = attn_weights.shape[0]
    out_dtype = msg.dtype
    if m == 0:
        return jnp.zeros((dim_size, d), dtype=out_dtype)

    lane = 128
    tm = max(lane, min(_round_up(tile_m, lane), _round_up(m, lane)))
    m_pad = _round_up(m, tm)
    num_tiles = m_pad // tm

    n_blk = max(8, min(_round_up(node_block, 8), _round_up(dim_size, 8)))
    n_pad = _round_up(dim_size, n_blk)
    num_node_blocks = n_pad // n_blk

    # Pad the message axis only; keep the native dtype and the native feature width.
    msg_p = jnp.zeros((m_pad, d), msg.dtype).at[:m, :].set(msg)
    # Padded messages get node id n_pad -> outside every node block (never selected).
    idx_p = jnp.full((1, m_pad), n_pad, jnp.int32).at[0, :m].set(index.astype(jnp.int32))

    itemsize = jnp.dtype(msg.dtype).itemsize
    # Rough per-step VMEM working-set estimate (bytes): one-hot + masked 3D max input
    # + lhs, head-row intermediates, resident output block, stats scratch, msg/idx
    # double buffers.  Cap at 48 MiB so v7x (64 MiB physical) keeps headroom.
    est = (4 * (n_blk * tm * (num_heads + 4)
                + tm * (4 * num_heads + 8)
                + 2 * n_blk * d
                + (2 * num_heads + 9) * max(n_blk, lane))
           + 2 * itemsize * tm * d
           + 2 * 8 * tm * 4)
    vmem_limit = int(min(48 * 2**20, max(32 * 2**20, 2 * est)))

    cost = pl.CostEstimate(
        flops=int(num_node_blocks * num_tiles
                  * (4 * num_heads * d * tm
                     + 2 * n_blk * tm * (4 * num_heads + 2 + d))),
        transcendentals=int(num_node_blocks * num_tiles
                            * (2 * num_heads * tm + num_heads * n_blk)),
        bytes_accessed=int(2 * num_node_blocks * (m_pad * d * itemsize + m_pad * 4)
                           + n_pad * d * 4
                           + 2 * num_node_blocks * num_tiles * num_heads * d * 4),
    )

    out = pl.pallas_call(
        _attn_agg_kernel,
        out_shape=jax.ShapeDtypeStruct((n_pad, d), jnp.float32),
        grid_spec=pltpu.PrefetchScalarGridSpec(
            num_scalar_prefetch=0,
            grid=(num_node_blocks, 2, num_tiles),   # (node block, phase, m-tile)
            in_specs=[
                pl.BlockSpec((1, tm), lambda nb, p, i: (0, i)),          # index (row layout)
                pl.BlockSpec((tm, d), lambda nb, p, i: (i, 0)),          # message tile
                pl.BlockSpec((num_heads, d), lambda nb, p, i: (0, 0)),   # head weights
            ],
            out_specs=pl.BlockSpec((n_blk, d), lambda nb, p, i: (nb, 0)),
            scratch_shapes=[
                # rows [0:H] running max, [H:2H] exp-sum (later 1/sum), [2H] count
                # (later 1/(count*H)) — one scratch so the phase-1 gather is one matmul.
                pltpu.VMEM((2 * num_heads + 1, n_blk), jnp.float32),
            ],
        ),
        compiler_params=pltpu.CompilerParams(
            dimension_semantics=("parallel", "arbitrary", "arbitrary"),
            vmem_limit_bytes=vmem_limit,
        ),
        cost_estimate=cost,
    )(idx_p, msg_p, attn_weights)

    return out[:dim_size, :].astype(out_dtype)


def _reference(msg, index, dim_size, W):
    """Pure-JAX reference (scatter_softmax + scatter mean over heads), for validation."""
    H, _ = W.shape
    scores = msg @ W.T                                                   # [m, H]
    seg_max = jax.ops.segment_max(scores, index, num_segments=dim_size)
    e = jnp.exp(scores - seg_max[index])
    seg_sum = jax.ops.segment_sum(e, index, num_segments=dim_size)
    attn = e / seg_sum[index]                                            # [m, H]
    cnt = jax.ops.segment_sum(jnp.ones((msg.shape[0], 1), msg.dtype), index,
                              num_segments=dim_size)
    cnt = jnp.maximum(cnt, 1.0)
    outs = []
    for h in range(H):
        s = jax.ops.segment_sum(attn[:, h:h + 1] * msg, index, num_segments=dim_size)
        outs.append(s / cnt)
    return jnp.mean(jnp.stack(outs, 0), 0)


if __name__ == "__main__":
    key = jax.random.PRNGKey(0)
    m, message_dim, num_heads, dim_size = 16, 32, 4, 8

    k_msg, k_idx, k_t, k_w = jax.random.split(key, 4)
    msg = jax.random.normal(k_msg, (m, message_dim), dtype=jnp.float32)
    # index into [0, 6) so nodes 6,7 are empty groups (exercise the empty-group path)
    index = jax.random.randint(k_idx, (m,), 0, 6, dtype=jnp.int32)
    t = jax.random.uniform(k_t, (m,), dtype=jnp.float32)  # unused (matches torch forward)

    # deterministic init of the H single-output linear layers (nn.Linear(D, 1, bias=False))
    bound = 1.0 / (message_dim ** 0.5)
    attn_weights = jax.random.uniform(k_w, (num_heads, message_dim),
                                      minval=-bound, maxval=bound, dtype=jnp.float32)

    out = simple_attention_aggregator(msg, index, t, dim_size, attn_weights)
    out = jax.block_until_ready(out)

    ref = _reference(msg, index, dim_size, attn_weights)
    assert out.shape == (dim_size, message_dim)
    assert jnp.allclose(out, ref, atol=1e-5, rtol=1e-5), "mismatch vs reference"
    print("KERNEL_OK")
</pallas_src>

<mosaic_0001>
module attributes {stable_mosaic.version = 11 : i64} {
  func.func @_attn_agg_kernel(%arg0: i32, %arg1: i32, %arg2: i32, %arg3: memref<1x128xi32, #tpu.memory_space<vmem>>, %arg4: memref<128x32xf32, #tpu.memory_space<vmem>>, %arg5: memref<4x32xf32, #tpu.memory_space<vmem>>, %arg6: memref<8x32xf32, #tpu.memory_space<vmem>>, %arg7: memref<9x8xf32, #tpu.memory_space<vmem>>) attributes {dimension_semantics = [#tpu.dimension_semantics<parallel>, #tpu.dimension_semantics<arbitrary>, #tpu.dimension_semantics<arbitrary>], iteration_bounds = array<i64: 1, 2, 1>, scalar_prefetch = 0 : i64, scratch_operands = 1 : i64, tpu.core_type = #tpu.core_type<tc>, window_params = [{transform_indices = @transform_0, window_bounds = array<i64: 1, 128>}, {transform_indices = @transform_1, window_bounds = array<i64: 128, 32>}, {pipeline_mode = #tpu.pipeline_mode<synchronous>, transform_indices = @transform_2, window_bounds = array<i64: 4, 32>}, {transform_indices = @transform_3, window_bounds = array<i64: 8, 32>}]} {
    %c0 = arith.constant 0 : index
    %c0_0 = arith.constant 0 : index
    %0 = vector.load %arg4[%c0, %c0_0] : memref<128x32xf32, #tpu.memory_space<vmem>>, vector<128x32xf32>
    %c0_1 = arith.constant 0 : index
    %c0_2 = arith.constant 0 : index
    %1 = vector.load %arg5[%c0_1, %c0_2] : memref<4x32xf32, #tpu.memory_space<vmem>>, vector<4x32xf32>
    %c0_3 = arith.constant 0 : index
    %c0_4 = arith.constant 0 : index
    %2 = vector.load %arg3[%c0_3, %c0_4] : memref<1x128xi32, #tpu.memory_space<vmem>>, vector<1x128xi32>
    %c8_i32 = arith.constant 8 : i32
    %3 = arith.muli %arg0, %c8_i32 : i32
    %4 = tpu.iota {dimensions = array<i32: 0>} : vector<8x128xi32>
    %5 = vector.broadcast %3 : i32 to vector<8x128xi32>
    %6 = arith.addi %4, %5 : vector<8x128xi32>
    %7 = vector.broadcast %2 : vector<1x128xi32> to vector<8x128xi32>
    %8 = arith.cmpi eq, %6, %7 : vector<8x128xi32>
    %9 = arith.extui %8 : vector<8x128xi1> to vector<8x128xi32>
    %10 = arith.sitofp %9 : vector<8x128xi32> to vector<8x128xf32>
    %11 = vector.broadcast %3 : i32 to vector<1x128xi32>
    %12 = arith.cmpi sge, %2, %11 : vector<1x128xi32>
    %c8_i32_5 = arith.constant 8 : i32
    %13 = arith.addi %3, %c8_i32_5 : i32
    %14 = vector.broadcast %13 : i32 to vector<1x128xi32>
    %15 = arith.cmpi slt, %2, %14 : vector<1x128xi32>
    %16 = arith.andi %12, %15 : vector<1x128xi1>
    %cst = arith.constant dense<0.000000e+00> : vector<4x128xf32>
    %17 = tpu.matmul %1, %0, %cst {dimension_numbers = #tpu.dot_dimension_numbers<[1], [1], [0], [0], [0, 0, 1, 0], [], []>} : vector<4x32xf32>, vector<128x32xf32>, vector<4x128xf32> -> vector<4x128xf32>
    %c0_i32 = arith.constant 0 : i32
    %18 = arith.cmpi eq, %arg1, %c0_i32 : i32
    %c0_i32_6 = arith.constant 0 : i32
    %19 = arith.cmpi eq, %arg2, %c0_i32_6 : i32
    %20 = arith.andi %18, %19 : i1
    %21 = arith.extui %20 : i1 to i32
    %c0_i32_7 = arith.constant 0 : i32
    %22 = arith.cmpi ne, %21, %c0_i32_7 : i32
    scf.if %22 {
      %29 = tpu.iota {dimensions = array<i32: 0>} : vector<9x8xi32>
      %c4_i32 = arith.constant 4 : i32
      %30 = vector.broadcast %c4_i32 : i32 to vector<9x8xi32>
      %31 = arith.cmpi slt, %29, %30 : vector<9x8xi32>
      %cst_11 = arith.constant -1.000000e+30 : f32
      %cst_12 = arith.constant 0.000000e+00 : f32
      %32 = vector.broadcast %cst_11 : f32 to vector<9x8xf32>
      %33 = vector.broadcast %cst_12 : f32 to vector<9x8xf32>
      %34 = arith.select %31, %32, %33 : vector<9x8xi1>, vector<9x8xf32>
      %c0_13 = arith.constant 0 : index
      %c0_14 = arith.constant 0 : index
      %35 = vector.load %arg7[%c0_13, %c0_14] : memref<9x8xf32, #tpu.memory_space<vmem>>, vector<9x8xf32>
      tpu.vector_store %arg7[%c0_13, %c0_14], %34 {strides = array<i32>} : memref<9x8xf32, #tpu.memory_space<vmem>>, vector<9x8xf32>,
    } else {
    }
    %c0_i32_8 = arith.constant 0 : i32
    %23 = arith.cmpi eq, %arg1, %c0_i32_8 : i32
    %24 = arith.extui %23 : i1 to i32
    %c0_i32_9 = arith.constant 0 : i32
    %25 = arith.cmpi ne, %24, %c0_i32_9 : i32
    scf.if %25 {
      %29 = vector.shape_cast %8 : vector<8x128xi1> to vector<1x8x128xi1>
      %30 = vector.shape_cast %17 : vector<4x128xf32> to vector<4x1x128xf32>
      %cst_11 = arith.constant -1.000000e+30 : f32
      %31 = vector.shape_cast %29 : vector<1x8x128xi1> to vector<1x8x128xi1>
      %32 = vector.broadcast %31 : vector<1x8x128xi1> to vector<4x8x128xi1>
      %33 = vector.shape_cast %30 : vector<4x1x128xf32> to vector<4x1x128xf32>
      %34 = vector.broadcast %33 : vector<4x1x128xf32> to vector<4x8x128xf32>
      %35 = vector.broadcast %cst_11 : f32 to vector<4x8x128xf32>
      %36 = arith.select %32, %34, %35 : vector<4x8x128xi1>, vector<4x8x128xf32>
      %cst_12 = arith.constant dense<0xFF800000> : vector<4x8xf32>
      %37 = vector.multi_reduction <maximumf>, %36, %cst_12 [2] : vector<4x8x128xf32> to vector<4x8xf32>
      %c0_13 = arith.constant 0 : index
      %c0_14 = arith.constant 0 : index
      %38 = vector.load %arg7[%c0_13, %c0_14] : memref<9x8xf32, #tpu.memory_space<vmem>>, vector<4x8xf32>
      %39 = arith.maximumf %38, %37 : vector<4x8xf32>
      %c0_15 = arith.constant 0 : index
      %c0_16 = arith.constant 0 : index
      %40 = vector.load %arg7[%c0_15, %c0_16] : memref<9x8xf32, #tpu.memory_space<vmem>>, vector<4x8xf32>
      tpu.vector_store %arg7[%c0_15, %c0_16], %39 {strides = array<i32>} : memref<9x8xf32, #tpu.memory_space<vmem>>, vector<4x8xf32>,
      %c4 = arith.constant 4 : index
      %c0_17 = arith.constant 0 : index
      %41 = vector.load %arg7[%c4, %c0_17] : memref<9x8xf32, #tpu.memory_space<vmem>>, vector<4x8xf32>
      %42 = arith.subf %38, %39 : vector<4x8xf32>
      %43 = math.exp %42 : vector<4x8xf32>
      %44 = arith.mulf %41, %43 : vector<4x8xf32>
      %c4_18 = arith.constant 4 : index
      %c0_19 = arith.constant 0 : index
      %45 = vector.load %arg7[%c4_18, %c0_19] : memref<9x8xf32, #tpu.memory_space<vmem>>, vector<4x8xf32>
      tpu.vector_store %arg7[%c4_18, %c0_19], %44 {strides = array<i32>} : memref<9x8xf32, #tpu.memory_space<vmem>>, vector<4x8xf32>,
      %cst_20 = arith.constant dense<0.000000e+00> : vector<4x128xf32>
      %46 = tpu.matmul %39, %10, %cst_20 {dimension_numbers = #tpu.dot_dimension_numbers<[1], [0], [0], [1], [0, 0, 1, 1], [], []>} : vector<4x8xf32>, vector<8x128xf32>, vector<4x128xf32> -> vector<4x128xf32>
      %47 = arith.subf %17, %46 : vector<4x128xf32>
      %cst_21 = arith.constant -1.000000e+30 : f32
      %48 = vector.shape_cast %16 : vector<1x128xi1> to vector<1x128xi1>
      %49 = vector.broadcast %48 : vector<1x128xi1> to vector<4x128xi1>
      %50 = vector.broadcast %cst_21 : f32 to vector<4x128xf32>
      %51 = arith.select %49, %47, %50 : vector<4x128xi1>, vector<4x128xf32>
      %52 = math.exp %51 : vector<4x128xf32>
      %cst_22 = arith.constant 1.000000e+00 : f32
      %53 = vector.broadcast %cst_22 : f32 to vector<1x128xf32>
      %54 = tpu.concatenate %52, %53 in 0 : vector<4x128xf32>, vector<1x128xf32> -> vector<5x128xf32>
      %cst_23 = arith.constant dense<0.000000e+00> : vector<5x8xf32>
      %55 = tpu.matmul %54, %10, %cst_23 {dimension_numbers = #tpu.dot_dimension_numbers<[1], [1], [0], [0], [0, 0, 1, 0], [], []>} : vector<5x128xf32>, vector<8x128xf32>, vector<5x8xf32> -> vector<5x8xf32>
      %c4_24 = arith.constant 4 : index
      %c0_25 = arith.constant 0 : index
      %56 = vector.load %arg7[%c4_24, %c0_25] : memref<9x8xf32, #tpu.memory_space<vmem>>, vector<5x8xf32>
      %57 = arith.addf %56, %55 : vector<5x8xf32>
      %c4_26 = arith.constant 4 : index
      %c0_27 = arith.constant 0 : index
      %58 = vector.load %arg7[%c4_26, %c0_27] : memref<9x8xf32, #tpu.memory_space<vmem>>, vector<5x8xf32>
      tpu.vector_store %arg7[%c4_26, %c0_27], %57 {strides = array<i32>} : memref<9x8xf32, #tpu.memory_space<vmem>>, vector<5x8xf32>,
    } else {
    }
    %c1_i32 = arith.constant 1 : i32
    %26 = arith.cmpi eq, %arg1, %c1_i32 : i32
    %27 = arith.extui %26 : i1 to i32
    %c0_i32_10 = arith.constant 0 : i32
    %28 = arith.cmpi ne, %27, %c0_i32_10 : i32
    scf.if %28 {
      %c0_i32_11 = arith.constant 0 : i32
      %29 = arith.cmpi eq, %arg2, %c0_i32_11 : i32
      %30 = arith.extui %29 : i1 to i32
      %c0_i32_12 = arith.constant 0 : i32
      %31 = arith.cmpi ne, %30, %c0_i32_12 : i32
      scf.if %31 {
        %c4 = arith.constant 4 : index
        %c0_23 = arith.constant 0 : index
        %53 = vector.load %arg7[%c4, %c0_23] : memref<9x8xf32, #tpu.memory_space<vmem>>, vector<4x8xf32>
        %cst_24 = arith.constant 0.000000e+00 : f32
        %54 = vector.broadcast %cst_24 : f32 to vector<4x8xf32>
        %55 = arith.cmpf ogt, %53, %54 : vector<4x8xf32>
        %cst_25 = arith.constant 1.000000e+00 : f32
        %56 = vector.broadcast %cst_25 : f32 to vector<4x8xf32>
        %57 = arith.divf %56, %53 : vector<4x8xf32>
        %cst_26 = arith.constant 0.000000e+00 : f32
        %58 = vector.broadcast %cst_26 : f32 to vector<4x8xf32>
        %59 = arith.select %55, %57, %58 : vector<4x8xi1>, vector<4x8xf32>
        %c4_27 = arith.constant 4 : index
        %c0_28 = arith.constant 0 : index
        %60 = vector.load %arg7[%c4_27, %c0_28] : memref<9x8xf32, #tpu.memory_space<vmem>>, vector<4x8xf32>
        tpu.vector_store %arg7[%c4_27, %c0_28], %59 {strides = array<i32>} : memref<9x8xf32, #tpu.memory_space<vmem>>, vector<4x8xf32>,
        %c8 = arith.constant 8 : index
        %c0_29 = arith.constant 0 : index
        %61 = vector.load %arg7[%c8, %c0_29] : memref<9x8xf32, #tpu.memory_space<vmem>>, vector<1x8xf32>
        %cst_30 = arith.constant 0.000000e+00 : f32
        %62 = vector.broadcast %cst_30 : f32 to vector<1x8xf32>
        %63 = arith.cmpf ogt, %61, %62 : vector<1x8xf32>
        %cst_31 = arith.constant 4.000000e+00 : f32
        %64 = vector.broadcast %cst_31 : f32 to vector<1x8xf32>
        %65 = arith.mulf %61, %64 : vector<1x8xf32>
        %cst_32 = arith.constant 1.000000e+00 : f32
        %66 = vector.broadcast %cst_32 : f32 to vector<1x8xf32>
        %67 = arith.divf %66, %65 : vector<1x8xf32>
        %cst_33 = arith.constant 0.000000e+00 : f32
        %68 = vector.broadcast %cst_33 : f32 to vector<1x8xf32>
        %69 = arith.select %63, %67, %68 : vector<1x8xi1>, vector<1x8xf32>
        %c8_34 = arith.constant 8 : index
        %c0_35 = arith.constant 0 : index
        %70 = vector.load %arg7[%c8_34, %c0_35] : memref<9x8xf32, #tpu.memory_space<vmem>>, vector<1x8xf32>
        tpu.vector_store %arg7[%c8_34, %c0_35], %69 {strides = array<i32>} : memref<9x8xf32, #tpu.memory_space<vmem>>, vector<1x8xf32>,
        %cst_36 = arith.constant 0.000000e+00 : f32
        %71 = vector.broadcast %cst_36 : f32 to vector<8x32xf32>
        %c0_37 = arith.constant 0 : index
        %c0_38 = arith.constant 0 : index
        %72 = vector.load %arg6[%c0_37, %c0_38] : memref<8x32xf32, #tpu.memory_space<vmem>>, vector<8x32xf32>
        tpu.vector_store %arg6[%c0_37, %c0_38], %71 {strides = array<i32>} : memref<8x32xf32, #tpu.memory_space<vmem>>, vector<8x32xf32>,
      } else {
      }
      %c0_13 = arith.constant 0 : index
      %c0_14 = arith.constant 0 : index
      %32 = vector.load %arg7[%c0_13, %c0_14] : memref<9x8xf32, #tpu.memory_space<vmem>>, vector<9x8xf32>
      %cst_15 = arith.constant dense<0.000000e+00> : vector<9x128xf32>
      %33 = tpu.matmul %32, %10, %cst_15 {dimension_numbers = #tpu.dot_dimension_numbers<[1], [0], [0], [1], [0, 0, 1, 1], [], []>} : vector<9x8xf32>, vector<8x128xf32>, vector<9x128xf32> -> vector<9x128xf32>
      %34 = vector.extract_strided_slice %33 {offsets = [0, 0], sizes = [4, 128], strides = [1, 1]} : vector<9x128xf32> to vector<4x128xf32>
      %35 = vector.extract_strided_slice %33 {offsets = [4, 0], sizes = [4, 128], strides = [1, 1]} : vector<9x128xf32> to vector<4x128xf32>
      %36 = vector.extract_strided_slice %33 {offsets = [8, 0], sizes = [1, 128], strides = [1, 1]} : vector<9x128xf32> to vector<1x128xf32>
      %37 = arith.subf %17, %34 : vector<4x128xf32>
      %cst_16 = arith.constant -1.000000e+30 : f32
      %38 = vector.shape_cast %16 : vector<1x128xi1> to vector<1x128xi1>
      %39 = vector.broadcast %38 : vector<1x128xi1> to vector<4x128xi1>
      %40 = vector.broadcast %cst_16 : f32 to vector<4x128xf32>
      %41 = arith.select %39, %37, %40 : vector<4x128xi1>, vector<4x128xf32>
      %42 = math.exp %41 : vector<4x128xf32>
      %43 = arith.mulf %42, %35 : vector<4x128xf32>
      %cst_17 = arith.constant dense<0.000000e+00> : vector<128xf32>
      %44 = vector.multi_reduction <add>, %43, %cst_17 [0] : vector<4x128xf32> to vector<128xf32>
      %45 = vector.shape_cast %44 : vector<128xf32> to vector<1x128xf32>
      %46 = arith.mulf %45, %36 : vector<1x128xf32>
      %47 = vector.broadcast %46 : vector<1x128xf32> to vector<8x128xf32>
      %48 = arith.mulf %10, %47 : vector<8x128xf32>
      %c0_18 = arith.constant 0 : index
      %c0_19 = arith.constant 0 : index
      %49 = vector.load %arg6[%c0_18, %c0_19] : memref<8x32xf32, #tpu.memory_space<vmem>>, vector<8x32xf32>
      %cst_20 = arith.constant dense<0.000000e+00> : vector<8x32xf32>
      %50 = tpu.matmul %48, %0, %cst_20 {dimension_numbers = #tpu.dot_dimension_numbers<[1], [0], [0], [1], [0, 0, 1, 1], [], []>} : vector<8x128xf32>, vector<128x32xf32>, vector<8x32xf32> -> vector<8x32xf32>
      %51 = arith.addf %49, %50 : vector<8x32xf32>
      %c0_21 = arith.constant 0 : index
      %c0_22 = arith.constant 0 : index
      %52 = vector.load %arg6[%c0_21, %c0_22] : memref<8x32xf32, #tpu.memory_space<vmem>>, vector<8x32xf32>
      tpu.vector_store %arg6[%c0_21, %c0_22], %51 {strides = array<i32>} : memref<8x32xf32, #tpu.memory_space<vmem>>, vector<8x32xf32>,
    } else {
    }
    return
  }
  func.func @transform_0(%arg0: i32, %arg1: i32, %arg2: i32) -> (i32, i32) {
    %c0_i32 = arith.constant 0 : i32
    %c0_i32_0 = arith.constant 0 : i32
    return %c0_i32, %arg2 : i32, i32
  }
  func.func @transform_1(%arg0: i32, %arg1: i32, %arg2: i32) -> (i32, i32) {
    %c0_i32 = arith.constant 0 : i32
    %c0_i32_0 = arith.constant 0 : i32
    return %arg2, %c0_i32 : i32, i32
  }
  func.func @transform_2(%arg0: i32, %arg1: i32, %arg2: i32) -> (i32, i32) {
    %c0_i32 = arith.constant 0 : i32
    %c0_i32_0 = arith.constant 0 : i32
    %c0_i32_1 = arith.constant 0 : i32
    return %c0_i32, %c0_i32_0 : i32, i32
  }
  func.func @transform_3(%arg0: i32, %arg1: i32, %arg2: i32) -> (i32, i32) {
    %c0_i32 = arith.constant 0 : i32
    %c0_i32_0 = arith.constant 0 : i32
    return %arg0, %c0_i32 : i32, i32
  }
}

</mosaic_0001>

<bundles_post_ra>
// kernel: simple_attention_aggregator.1
= control target key start
LH: loop header
LB: loop body
LE: loop exit
PB: predicated region body
PF: predicated region fallthrough
CT: control target
= control target key end

     0   :  { %8 = vsyncpa [#allocation4], 0  ;;  %s1277_s12 = smov 0   ;;  %s1279_s13 = smov 0   ;;  %s1506_s0 = inlined_call_operand.vmem [shape: s32[1,128], index: 0, kind: input, shape index: {}]   ;;  %s1507_s1 = inlined_call_operand.vmem [shape: f32[128,32], index: 1, kind: input, shape index: {}]   ;;  %s1508_s2 = inlined_call_operand.vmem [shape: f32[4,32], index: 2, kind: input, shape index: {}]   ;;  %s1509_s3 = inlined_call_operand.hbm [shape: f32[8,32], index: 3, kind: output, shape index: {}]  }
   0x1   :  { %s1281_s14 = smov 0  }
   0x2 LB: > { %s914_s15 = sadd.s32 4294967295, %s1240_s14   ;;  %s29_s16 = sadd.s32 1, %s1236_s13  ;;  %s1240_s14 = sphi %s1281_s14, %s14_s14   ;;  %s1236_s13 = sphi %s1279_s13, %s1518_s13   ;;  %s1232_s12 = sphi %s1277_s12, %s1517_s12  }
   0x3   : > { %p31_p0 = scmp.ge.s32.totalorder %s29_s16, 2  ;;  %p918_p1 = scmp.ge.s32.totalorder %s1240_s14, 1 }
   0x4   : > { %p166_p2 = scmp.lt.s32.totalorder %s1240_s14, 3 }
   0x5   : > { %s1520_s16 = smov (%p31_p0, %s29_s16), 0 }
   0x6   : > { %p167_p3 = pnand %p918_p1, %p166_p2 }
   0x7   : > { %v197_v0 = vld [vmem:[%s1507_s1] sm:$0xff] (!%p167_p3)  ;;  %v198_v1 = vld [vmem:[%s1507_s1 + $0x8] sm:$0xff] (!%p167_p3)  ;;  %vm232_vm0 = vcmask (!%p167_p3), 261120   ;;  %v216_v2 = vlaneseq (!%p167_p3)  ;;  %v1242_v3 = vmov (!%p167_p3), 0.0|0.0   ;;  %vm1243_vm2 = vmmov (!%p167_p3), 0   ;;  %v199_v8 = vld [vmem:[%s1507_s1 + $0x10] sm:$0xff] (!%p167_p3) }
   0x8   : > { %170 = sbr.rel (%p167_p3) target bundleno = 1417 (0x589), region = 32  ;;  %1077 = vmatprep.subr.bf16.mxu0 (!%p167_p3), %v1242_v3  ;;  %v1304_v4 = vpack.c.bf16 (!%p167_p3), %v198_v1, %v197_v0  ;;  %vm1308_vm1 = vmpackc.low (!%p167_p3), %vm232_vm0, %vm232_vm0  ;;  %v1244_v7 = vmov (!%p167_p3), 0.0   ;;  %v200_v9 = vld [vmem:[%s1507_s1 + $0x18] sm:$0xff] (!%p167_p3)  ;;  %v214_v11 = vld [vmem:[%s1506_s0] sm:$0x1] (!%p167_p3)  ;;  %p354_p4 = scmp.eq.s32.totalorder (!%p167_p3), %s1232_s12, 0 }
   0x9   : > { %v1313_v6 = vshrl.u32 (!%p167_p3), %v216_v2, 7  ;;  %1024 = vmatprep.mubr.msk.f32.mxu0 (!%p167_p3), %vm1243_vm2, %v1244_v7  ;;  %vm227_vm3 = vcmp.ge.s32.totalorder (!%p167_p3), %v214_v11, 0  ;;  %vm230_vm4 = vcmp.lt.s32.totalorder (!%p167_p3), %v214_v11, 8  ;;  %v1331_v13 = vpack.c.bf16 (!%p167_p3), %v200_v9, %v199_v8  ;;  %v201_v17 = vld [vmem:[%s1507_s1 + $0x20] sm:$0xff] (!%p167_p3)  ;;  %v202_v18 = vld [vmem:[%s1507_s1 + $0x28] sm:$0xff] (!%p167_p3)  ;;  %v203_v20 = vld [vmem:[%s1507_s1 + $0x30] sm:$0xff] (!%p167_p3) }
   0xa   : > { %1080 = vmatpush3.bf16.xpose.msk.msra.mxu0 (!%p167_p3), %vm1308_vm1, %v1304_v4  ;;  %vm1333_vm5 = vmand (!%p167_p3), %vm227_vm3, %vm230_vm4  ;;  %v1355_v19 = vpack.c.bf16 (!%p167_p3), %v202_v18, %v201_v17  ;;  %v204_v21 = vld [vmem:[%s1507_s1 + $0x38] sm:$0xff] (!%p167_p3)  ;;  %v205_v23 = vld [vmem:[%s1507_s1 + $0x40] sm:$0xff] (!%p167_p3) }
   0xb   : > { %1081 = vmatprep.subr.bf16.mxu0 (!%p167_p3), %v1242_v3  ;;  %v1325_v10 = vsub.s32 (!%p167_p3), 0, %v1313_v6  ;;  %v1366_v22 = vpack.c.bf16 (!%p167_p3), %v204_v21, %v203_v20  ;;  %v206_v24 = vld [vmem:[%s1507_s1 + $0x48] sm:$0xff] (!%p167_p3)  ;;  %v207_v26 = vld [vmem:[%s1507_s1 + $0x50] sm:$0xff] (!%p167_p3)  ;;  %v208_v27 = vld [vmem:[%s1507_s1 + $0x58] sm:$0xff] (!%p167_p3) }
   0xc   : > { %v1377_v25 = vpack.c.bf16 (!%p167_p3), %v206_v24, %v205_v23  ;;  %v1388_v28 = vpack.c.bf16 (!%p167_p3), %v208_v27, %v207_v26  ;;  %v209_v29 = vld [vmem:[%s1507_s1 + $0x60] sm:$0xff] (!%p167_p3)  ;;  %v210_v30 = vld [vmem:[%s1507_s1 + $0x68] sm:$0xff] (!%p167_p3)  ;;  %v211_v32 = vld [vmem:[%s1507_s1 + $0x70] sm:$0xff] (!%p167_p3) }
   0xd   : > { %v223_v12 = vrot.slane (!%p167_p3), %v214_v11, %v1325_v10  ;;  %v1399_v31 = vpack.c.bf16 (!%p167_p3), %v210_v30, %v209_v29  ;;  %v212_v33 = vld [vmem:[%s1507_s1 + $0x78] sm:$0xff] (!%p167_p3)  ;;  %v213_v35 = vld [vmem:[%s1508_s2] sm:$0xf] (!%p167_p3) }
   0xe   : > { %v1410_v34 = vpack.c.bf16 (!%p167_p3), %v212_v33, %v211_v32 }
   0xf   : > { %vm1338_vm6 = vcmp.eq.s32.totalorder %v1313_v6, %v223_v12  ;;  %vm361_vm7 = vcmp.lt.s32.totalorder (%p354_p4), %v1313_v6, 4  ;;  %vm365_vm8 = vcmask (%p354_p4), 64512   ;;  %vm367_vm9 = vcmask (%p354_p4), 57344  }
  0x10   : > { %v1344_v16 = vsel %vm1338_vm6, 1.0, %v1244_v7  ;;  %v1245_v38 = vmov (%p354_p4), 0.0  }
  0x11   : > { %v363_v39 = vsel (%p354_p4), %vm361_vm7, -1e+30, %v1245_v38  ;;  %368 = vst.msk [vmem:[#allocation2 + $0x8] sm:$0x1] (%p354_p4), %vm367_vm9, %v1245_v38 }
  0x12   : > { %1084 = vmatpush3.bf16.xpose.msk.msra.mxu0 %vm1308_vm1, %v1331_v13  ;;  %366 = vst.msk [vmem:[#allocation2] sm:$0xff] (%p354_p4), %vm365_vm8, %v363_v39 }
  0x13   : > { %1085 = vmatprep.subr.bf16.mxu0 %v1242_v3 }
  0x1a   : > { %1088 = vmatpush3.bf16.xpose.msk.msra.mxu0 %vm1308_vm1, %v1355_v19 }
  0x1b   : > { %1089 = vmatprep.subr.bf16.mxu0 %v1242_v3 }
  0x22   : > { %1092 = vmatpush3.bf16.xpose.msk.msra.mxu0 %vm1308_vm1, %v1366_v22 }
  0x23   : > { %1093 = vmatprep.subr.bf16.mxu0 %v1242_v3 }
  0x2a   : > { %1096 = vmatpush3.bf16.xpose.msk.msra.mxu0 %vm1308_vm1, %v1377_v25 }
  0x2b   : > { %1097 = vmatprep.subr.bf16.mxu0 %v1242_v3 }
  0x32   : > { %1100 = vmatpush3.bf16.xpose.msk.msra.mxu0 %vm1308_vm1, %v1388_v28 }
  0x33   : > { %1101 = vmatprep.subr.bf16.mxu0 %v1242_v3 }
  0x3a   : > { %1104 = vmatpush3.bf16.xpose.msk.msra.mxu0 %vm1308_vm1, %v1399_v31 }
  0x3b   : > { %1105 = vmatprep.subr.bf16.mxu0 %v1242_v3 }
  0x42   : > { %1108 = vmatpush3.bf16.xpose.msk.msra.mxu0 %vm1308_vm1, %v1410_v34 }
  0x49   : > { %1025 = vmatmul.mubr.msk.f32.vlgmr.msra.gmra.mrb[0].mxu0 %vm232_vm0, %v213_v35 }
 0x117   : > { %359 = sbr.rel (!%p354_p4) target bundleno = 286 (0x11e), region = 36 }
 0x11c   : > { %v1420_v36 = vpop.f32.mrb[0].mxu0 }
 0x11d   : > { %v1026_v37 = vpop.f32.mrb[1].mxu0 }
 0x11e PF: > { %p938_p5 = scmp.ne.s32.totalorder %s1232_s12, 0 }
 0x11f   : > { %v1246_v40 = vmov (!%p938_p5), 1966171168   ;;  %v1247_v58 = vmov (!%p938_p5), 0.0   ;;  %v1248_v59 = vmov (!%p938_p5), 1.0   ;;  %vm1249_vm10 = vmmov (!%p938_p5), 0  }
 0x120   : > { %371 = sbr.rel (%p938_p5) target bundleno = 898 (0x382), region = 40  ;;  %v374_v41 = vunpack.c.l.s4 (!%p938_p5), %v1246_v40  ;;  %1027 = vmatprep.subr.mxu0 (!%p938_p5), %v1247_v58  ;;  %1032 = vmatprep.subr.mxu1 (!%p938_p5), %v1247_v58  ;;  %v436_v60 = vand.u32 (!%p938_p5), 127, %v216_v2  ;;  %vm453_vm11 = vcmask (!%p938_p5), 1041409   ;;  %vm455_vm12 = vcmask (!%p938_p5), 1042434   ;;  %v430_v9 = vld [vmem:[#allocation2] sm:$0xf] (!%p938_p5) }
 0x121   : > { %1028 = vmatpush3.msk.msra.mxu0 (!%p938_p5), %vm1338_vm6, %v1248_v59  ;;  %1029 = vmatprep.mubr.msk.f32.mxu0 (!%p938_p5), %vm1249_vm10, %v1247_v58  ;;  %vm457_vm13 = vcmask (!%p938_p5), 1043459   ;;  %vm461_vm14 = vcmask (!%p938_p5), 60416   ;;  %vm469_vm15 = vcmask (!%p938_p5), 64512   ;;  %v463_v20 = vld [vmem:[#allocation2 + $0x4] sm:$0xf] (!%p938_p5)  ;;  %v1250_v24 = vmov (!%p938_p5), 0  }
 0x122   : > { %v375_v42 = vunpack.c.0.s8 (!%p938_p5), %v374_v41  ;;  %1033 = vmatpush3.xpose.msk.msra.mxu1 (!%p938_p5), %vm1338_vm6, %v1248_v59  ;;  %1034 = vmatprep.mubr.msk.f32.mxu1 (!%p938_p5), %vm1249_vm10, %v1247_v58  ;;  %v439_v62 = vsub.s32 (!%p938_p5), %v436_v60, %v1313_v6  ;;  %v544_v26 = vsel (!%p938_p5), %vm1333_vm5, 1, %v1250_v24  ;;  %vm553_vm2 = vcmask (!%p938_p5), 1043456  }
 0x123   : > { %v548_v27 = vrot.slane (!%p938_p5), %v544_v26, %v1325_v10  ;;  %vm627_vm3 = vcmask (!%p938_p5), 61440  }
 0x124   : > { %v378_v43 = vsub.s32 (!%p938_p5), %v375_v42, %v1313_v6 }
 0x125   : > { %vm549_vm1 = vcmp.eq.s32.totalorder (!%p938_p5), %v548_v27, 1 }
 0x126   : > { %v379_v44 = vrot.slane (!%p938_p5), %v1420_v36, %v378_v43 }
 0x128   : > { %v387_v45 = vrot.slane %v379_v44, %v378_v43  ;;  %v380_v46 = vcombine.high %v379_v44, %v379_v44 }
 0x12a   : > { %v401_v47 = vrot.slane %v387_v45, %v1325_v10  ;;  %v395_v48 = vcombine.high %v387_v45, %v387_v45  ;;  %v394_v49 = vrot.slane %v380_v46, %v378_v43 }
 0x12c   : > { %v418_v50 = vsel %vm1338_vm6, %v401_v47, -1e+30  ;;  %v409_v51 = vrot.slane %v395_v48, %v1325_v10  ;;  %v405_v52 = vrot.slane %v394_v49, %v1325_v10  ;;  %v396_v53 = vcombine.high %v394_v49, %v394_v49 }
 0x12d   : > { %422 = vmax.xlane.f32.xlu0 %v418_v50 }
 0x12e   : > { %v420_v54 = vsel %vm1338_vm6, %v409_v51, -1e+30  ;;  %v419_v55 = vsel %vm1338_vm6, %v405_v52, -1e+30  ;;  %v413_v56 = vrot.slane %v396_v53, %v1325_v10 }
 0x12f   : > { %426 = vmax.xlane.f32.xlu1 %v420_v54 }
 0x130   : > { %v421_v57 = vsel %vm1338_vm6, %v413_v56, -1e+30 }
 0x131   : > { %424 = vmax.xlane.f32.xlu0 %v419_v55 }
 0x133   : > { %428 = vmax.xlane.f32.xlu1 %v421_v57 }
 0x1ba   : > { %v423_v61 = vpop.xlane.xlu0 %422 }
 0x1bb   : > { %v440_v1 = vrot.slane %v423_v61, %v439_v62 }
 0x1bc   : > { %v427_v63 = vpop.xlane.xlu1 %426 }
 0x1bd   : > { %v448_v5 = vrot.slane %v427_v63, %v439_v62 }
 0x1be   : > { %v425_v0 = vpop.xlane.xlu0 %424 }
 0x1bf   : > { %v444_v3 = vrot.slane %v425_v0, %v439_v62 }
 0x1c0   : > { %v429_v7 = vpop.xlane.xlu1 %428 }
 0x1c1   : > { %v454_v8 = vsel %vm453_vm11, %v444_v3, %v440_v1  ;;  %v452_v11 = vrot.slane %v429_v7, %v439_v62 }
 0x1c2   : > { %v456_v12 = vsel %vm455_vm12, %v448_v5, %v454_v8 }
 0x1c3   : > { %v458_v17 = vsel %vm457_vm13, %v452_v11, %v456_v12 }
 0x1c4   : > { %v460_v2 = vmax.f32 %v430_v9, %v458_v17 }
 0x1c6   : > { %462 = vst.msk [vmem:[#allocation2] sm:$0xf] %vm461_vm14, %v460_v2  ;;  %v464_v18 = vsub.f32 %v430_v9, %v460_v2  ;;  %1030 = vmatmul.mubr.msk.f32.vlgmr.msra.gmra.mrb[0].mxu0 %vm469_vm15, %v460_v2 }
 0x1c8   : > { %v465_v6 = vmul.f32 1.442695, %v464_v18 }
 0x1ca   : > { %1178 = vpow2.f32 %v465_v6 }
 0x1d4   : > { %v1179_v21 = vpop.eup %1178 }
 0x1d5   : > { %v467_v23 = vmul.f32 %v1179_v21, %v463_v20 }
 0x1d7   : > { %468 = vst.msk [vmem:[#allocation2 + $0x4] sm:$0xf] %vm461_vm14, %v467_v23 }
 0x1de   : > { %v625_v40 = vld [vmem:[#allocation2 + $0x4] sm:$0x1f] }
 0x299   : > { %v539_v29 = vpop.f32.mrb[0].mxu0 }
 0x29a   : > { %v543_v30 = vsub.f32 %v1420_v36, %v539_v29  ;;  %v1031_v32 = vpop.f32.mrb[1].mxu0 }
 0x29c   : > { %v550_v33 = vsel %vm549_vm1, %v543_v30, -1e+30 }
 0x29d   : > { %v551_v35 = vmul.f32 1.442695, %v550_v33 }
 0x29f   : > { %1180 = vpow2.f32 %v551_v35 }
 0x2a9   : > { %v1181_v37 = vpop.eup %1180 }
 0x2aa   : > { %v554_v38 = vsel %vm553_vm2, %v1181_v37, 1.0 }
 0x2ab   : > { %1035 = vmatmul.mubr.f32.vlgmr.msra.gmra.mrb[0].mxu1 %v554_v38 }
 0x37e   : > { %v621_v39 = vpop.f32.mrb[0].mxu1 }
 0x37f   : > { %v626_v41 = vadd.f32 %v625_v40, %v621_v39  ;;  %v1036_v42 = vpop.f32.mrb[1].mxu1 }
 0x381   : > { %628 = vst.msk [vmem:[#allocation2 + $0x4] sm:$0x1f] %vm627_vm3, %v626_v41 }
 0x382 PF: > { %p942_p6 = scmp.ne.s32.totalorder %s1232_s12, 1 }
 0x383   : > { %v1251_v44 = vmov (!%p942_p6), 1.0   ;;  %vm641_vm7 = vcmask (!%p942_p6), 60416   ;;  %vm649_vm9 = vcmask (!%p942_p6), 57344   ;;  %vm654_vm10 = vcmask (!%p942_p6), 64512  }
 0x384   : > { %632 = sbr.rel (%p942_p6) target bundleno = 1392 (0x570), region = 44  ;;  %1037 = vmatprep.subr.msk.mxu0 (!%p942_p6), %vm1338_vm6, %v1251_v44  ;;  %v1252_v53 = vmov (!%p942_p6), 0.0|0.0   ;;  %v1253_v15 = vmov (!%p942_p6), 0.0   ;;  %vm750_vm12 = vcmask (!%p942_p6), 1043456  }
 0x385   : > { %1038 = vmatpush3.msk.msra.mxu0 (!%p942_p6), %vm1338_vm6, %v1251_v44  ;;  %1109 = vmatprep.subr.bf16.mxu1 (!%p942_p6), %v1252_v53  ;;  %651 = vst.msk [vmem:[#allocation3] sm:$0xff] (!%p942_p6), %vm232_vm0, %v1253_v15  ;;  %vm1254_vm6 = vmmov (!%p942_p6), 0  }
 0x386   : > { %1111 = vmatpush3.bf16.msra.mxu1 (!%p942_p6), %v1304_v4  ;;  %1074 = vmatprep.mubr.msk.f32.mxu1 (!%p942_p6), %vm1254_vm6, %v1253_v15  ;;  %v1255_v4 = vmov (!%p942_p6), 0  }
 0x387   : > { %1112 = vmatprep.subr.bf16.mxu1 (!%p942_p6), %v1252_v53 }
 0x388   : > { %v636_v43 = vld [vmem:[#allocation2 + $0x4] sm:$0xf] (!%p942_p6)  ;;  %v643_v45 = vld [vmem:[#allocation2 + $0x8] sm:$0x1] (!%p942_p6) }
 0x389   : > { %1182 = vrcp.f32 (!%p942_p6), %v636_v43  ;;  %v645_v46 = vmul.f32 (!%p942_p6), 4.0, %v643_v45  ;;  %vm637_vm4 = vcmp.gt.f32.partialorder (!%p942_p6), %v636_v43, 0.0  ;;  %vm644_vm8 = vcmp.gt.f32.partialorder (!%p942_p6), %v643_v45, 0.0 }
 0x38a   : > { %1114 = vmatpush3.bf16.msra.mxu1 (!%p942_p6), %v1331_v13  ;;  %v737_v13 = vsel (!%p942_p6), %vm1333_vm5, 1, %v1255_v4 }
 0x38b   : > { %1184 = vrcp.f32 %v645_v46  ;;  %1115 = vmatprep.subr.bf16.mxu1 %v1252_v53 }
 0x38e   : > { %1117 = vmatpush3.bf16.msra.mxu1 %v1355_v19  ;;  %v741_v19 = vrot.slane %v737_v13, %v1325_v10 }
 0x38f   : > { %1118 = vmatprep.subr.bf16.mxu1 %v1252_v53 }
 0x390   : > { %vm742_vm11 = vcmp.eq.s32.totalorder %v741_v19, 1 }
 0x392   : > { %1120 = vmatpush3.bf16.msra.mxu1 %v1366_v22 }
 0x393   : > { %v1183_v47 = vpop.eup %1182  ;;  %1121 = vmatprep.subr.bf16.mxu1 %v1252_v53 }
 0x394   : > { %v640_v48 = vsel %vm637_vm4, %v1183_v47, 0.0 }
 0x395   : > { %642 = vst.msk [vmem:[#allocation2 + $0x4] sm:$0xf] %vm641_vm7, %v640_v48  ;;  %v1185_v49 = vpop.eup %1184 }
 0x396   : > { %v648_v50 = vsel %vm644_vm8, %v1185_v49, 0.0  ;;  %1123 = vmatpush3.bf16.msra.mxu1 %v1377_v25 }
 0x397   : > { %650 = vst.msk [vmem:[#allocation2 + $0x8] sm:$0x1] %vm649_vm9, %v648_v50  ;;  %1124 = vmatprep.subr.bf16.mxu1 %v1252_v53 }
 0x39a   : > { %1126 = vmatpush3.bf16.msra.mxu1 %v1388_v28 }
 0x39b   : > { %1127 = vmatprep.subr.bf16.mxu1 %v1252_v53 }
 0x39c   : > { %v652_v51 = vld [vmem:[#allocation2] sm:$0xff] }
 0x39d   : > { %1039 = vmatprep.mubr.msk.f32.mxu0 %vm654_vm10, %v652_v51 }
 0x39e   : > { %v653_v52 = vld [vmem:[#allocation2 + $0x8] sm:$0x1]  ;;  %1129 = vmatpush3.bf16.msra.mxu1 %v1399_v31 }
 0x39f   : > { %1040 = vmatmul.mubr.msk.f32.vlgmr.msra.gmra.mrb[0].mxu0 %vm654_vm10, %v653_v52  ;;  %1130 = vmatprep.subr.bf16.mxu1 %v1252_v53 }
 0x3a2   : > { %1132 = vmatpush3.bf16.msra.mxu1 %v1410_v34 }
 0x472   : > { %v1041_v22 = vpop.f32.mrb[0].mxu0 }
 0x473   : > { %v727_v25 = vpop.f32.mrb[1].mxu0 }
 0x474   : > { %v736_v28 = vsub.f32 %v1420_v36, %v727_v25  ;;  %v747_v56 = vrot.slane %v727_v25, 4  ;;  %v764_v36 = vld [vmem:[#allocation3] sm:$0xff] }
 0x476   : > { %v743_v54 = vsel %vm742_vm11, %v736_v28, -1e+30 }
 0x477   : > { %v744_v55 = vmul.f32 1.442695, %v743_v54 }
 0x479   : > { %1186 = vpow2.f32 %v744_v55 }
 0x483   : > { %v1187_v57 = vpop.eup %1186 }
 0x484   : > { %v749_v31 = vmul.f32 %v1187_v57, %v747_v56 }
 0x486   : > { %v751_v58 = vsel %vm750_vm12, %v749_v31, 0.0 }
 0x487   : > { %v752_v34 = vrot.slane %v751_v58, 4 }
 0x489   : > { %v753_v59 = vadd.f32 %v752_v34, %v751_v58 }
 0x48b   : > { %v754_v60 = vrot.slane %v753_v59, 2 }
 0x48d   : > { %v755_v14 = vadd.f32 %v754_v60, %v753_v59 }
 0x48f   : > { %v756_v61 = vrot.slane %v755_v14, 1 }
 0x491   : > { %v757_v62 = vadd.f32 %v756_v61, %v755_v14 }
 0x493   : > { %v758_v63 = vmul.f32 %v1041_v22, %v757_v62 }
 0x495   : > { %v762_v0 = vrot.slane %v758_v63, %v1325_v10 }
 0x497   : > { %v763_v1 = vmul.f32 %v1344_v16, %v762_v0 }
 0x499   : > { %1075 = vmatmul.mubr.f32.vlgmr.msra.gmra.mrb[0].mxu1 %v763_v1 }
 0x56c   : > { %v831_v3 = vpop.f32.mrb[0].mxu1 }
 0x56d   : > { %v835_v5 = vadd.f32 %v831_v3, %v764_v36  ;;  %v1076_v7 = vpop.f32.mrb[1].mxu1 }
 0x56f   : > { %836 = vst.msk [vmem:[#allocation3] sm:$0xff] %vm232_vm0, %v835_v5 }
 0x570 PF: > { %p1471_p7 = scmp.eq.s32.totalorder %s914_s15, 1  ;;  %s1256_s4 = smov [#allocation3]  }
 0x571   : > { %s846_s5 = sshll.u32 %s1256_s4, 4  ;;  %s847_s5 = int_to_ptr.vmem [resolvable:$true] %s846_s5 }
 0x572   : > { %s1188_s6 = scalar_lea.vmem %s847_s5, 128  ;;  %p1195_p11 = scmp.lt.s32.totalorder %s847_s5, %s847_s5 }
 0x573   : > { %p1189_p8 = scmp.ne.s32.totalorder %s847_s5, %s1188_s6  ;;  %p1196_p12 = scmp.lt.s32.totalorder %s1188_s6, %s1188_s6 }
 0x575   : > { %p1190_p9 = pnand %p1189_p8, %p1471_p7  ;;  %p1197_p13 = por %p1196_p12, %p1195_p11 }
 0x577   : > { %p1191_p10 = pneg %p1190_p9 }
 0x579   : > { %p1198_p0 = pnand %p1197_p13, %p1191_p10 }
 0x57b   : > { %1201 = shalt.err (!%p1198_p0)
}
 0x57c   : > { %s1202_s15 = scalar_lea.hbm %s1509_s3, 128 }
 0x57d   : > { %p1203_p1 = scmp.ne.s32.totalorder %s1509_s3, %s1202_s15  ;;  %p1208_p4 = scmp.lt.u32.totalorder %s1202_s15, %s1509_s3 }
 0x57f   : > { %p1204_p2 = pnand %p1203_p1, %p1471_p7 }
 0x581   : > { %p1205_p3 = pneg %p1204_p2 }
 0x583   : > { %p1210_p5 = pnand %p1208_p4, %p1205_p3 }
 0x585   : > { %1213 = shalt.err (!%p1210_p5)
}
 0x586   : > { %1134 = dma.vmem_to_hbm [thread:$0]  (%p1471_p7), %s847_s5, 128, %s1509_s3, [#allocation4]  }
 0x587   : > { %1227 = dma.done.wait (%p1471_p7), [#allocation4], 128  }
 0x588   : > { %1229 = vsyncadd (%p1471_p7), [#allocation4], 4294967168 }
 0x589 PF: > { %s14_s14 = sadd.s32 1, %s1240_s14   ;;  %s1517_s12 = smov %s1236_s13 }
 0x58a   : > { %p11_p6 = scmp.ge.s32.totalorder %s14_s14, 4   ;;  %s1518_s13 = smov %s1520_s16 }
 0x58c   :  { %13 = sbr.rel (!%p11_p6) target bundleno = 2 (0x2), region = 79 }
 0x593   :  { %859 = vsyncpa [#allocation4], 1 }
 0x594   :  { %861 = vsyncpa [#allocation4 + $0x1], 1 }

</bundles_post_ra>
